<compile_context>
chip_gen: v7x
topology: tpu7x:2x2x1
jax: 0.10.0
libtpu: 0.0.40
codegen_flags: <defaults>
</compile_context>

<pallas_src>
import math

import jax
import jax.numpy as jnp
from jax.experimental import pallas as pl
from jax.experimental.pallas import tpu as pltpu


def _round_up(x, m):
    return ((x + m - 1) // m) * m


def _make_policy_kernel(input_dim, use_vpu_first_layer):
    def kernel(x_ref, w1_ref, b1_ref, w2_ref, b2_ref, w3_ref, b3_ref,
               w4_ref, b4_ref, mean_ref):
        x = x_ref[...]

        # ---- layer 1: Linear(input_dim -> hidden) + ReLU -------------------
        if use_vpu_first_layer:
            # K is tiny (e.g. 3): unrolled broadcast-multiply-adds on the VPU
            # instead of a low-occupancy MXU pass.
            w1 = w1_ref[...]
            h = b1_ref[...] + x[:, 0:1] * w1[0:1, :]
            for k in range(1, input_dim):
                h = h + x[:, k:k + 1] * w1[k:k + 1, :]
        else:
            h = jnp.dot(x, w1_ref[...],
                        preferred_element_type=jnp.float32) + b1_ref[...]
        h = jnp.maximum(h, 0.0)

        # ---- layer 2: Linear(hidden -> hidden) + ReLU ----------------------
        h = jnp.dot(h, w2_ref[...],
                    preferred_element_type=jnp.float32) + b2_ref[...]
        h = jnp.maximum(h, 0.0)

        # ---- layer 3: Linear(hidden -> hidden//2) + ReLU -------------------
        h = jnp.dot(h, w3_ref[...],
                    preferred_element_type=jnp.float32) + b3_ref[...]
        h = jnp.maximum(h, 0.0)

        # ---- layer 4: Linear(hidden//2 -> output_dim) + Tanh, *5.0 ---------
        out = jnp.dot(h, w4_ref[...],
                      preferred_element_type=jnp.float32) + b4_ref[...]
        mean_ref[...] = 5.0 * jnp.tanh(out)

    return kernel


def _choose_tiling(batch, tile_batch):
    """Pick (tb, padded_batch, n_tiles) so tiles divide the work evenly.

    Aims for >= 2 grid iterations when the batch allows it (>= 2 sublane
    tiles) so the parallel batch axis can shard across both TensorCores on
    v7x; caps the tile at `tile_batch` rows so per-step overhead amortizes
    without blowing the VMEM budget.
    """
    pbm = _round_up(batch, 8)                 # minimum padded batch (sublanes)
    n_tiles = max(1, -(-pbm // tile_batch))   # cdiv
    if n_tiles == 1 and pbm >= 16:
        n_tiles = 2                           # let megacore (v7x) split the grid
    tb = _round_up(-(-pbm // n_tiles), 8)     # round_up(cdiv(pbm, n_tiles), 8)
    padded_batch = tb * n_tiles
    return tb, padded_batch, n_tiles


def policy_forward(state, params, *, tile_batch=1024):
    """Returns (action_mean, action_std) — the parameters of the Normal dist.

    action_mean: (batch, output_dim); action_std: (1, output_dim) (the std is
    state-independent, exactly as in the PyTorch module).
    """
    batch, input_dim = state.shape
    hidden_dim = params["w1"].shape[1]
    h2 = params["w3"].shape[1]
    output_dim = params["w4"].shape[1]

    tb, padded_batch, n_tiles = _choose_tiling(batch, tile_batch)
    if padded_batch != batch:
        state_p = jnp.zeros((padded_batch, input_dim), state.dtype)
        state_p = state_p.at[:batch].set(state)
    else:
        state_p = state
    grid = (n_tiles,)

    def batch_tile(shape):
        return pl.BlockSpec(shape, lambda i: (i, 0))

    def resident(shape):
        # Weight / bias blocks keep the same block index across the batch
        # grid, so they stay VMEM-resident (no re-DMA per step).
        return pl.BlockSpec(shape, lambda i: (0, 0))

    use_vpu_first_layer = input_dim <= 8
    kernel = _make_policy_kernel(input_dim, use_vpu_first_layer)

    mean_padded = pl.pallas_call(
        kernel,
        out_shape=jax.ShapeDtypeStruct((padded_batch, output_dim), jnp.float32),
        grid=grid,
        in_specs=[
            batch_tile((tb, input_dim)),
            resident((input_dim, hidden_dim)), resident((1, hidden_dim)),
            resident((hidden_dim, hidden_dim)), resident((1, hidden_dim)),
            resident((hidden_dim, h2)), resident((1, h2)),
            resident((h2, output_dim)), resident((1, output_dim)),
        ],
        # Block last-dim == full array dim (output_dim), so no lane padding:
        # the kernel writes only real data back to HBM.
        out_specs=batch_tile((tb, output_dim)),
        compiler_params=pltpu.CompilerParams(
            dimension_semantics=("parallel",),
            vmem_limit_bytes=32 * 1024 * 1024,
        ),
    )(state_p,
      params["w1"], params["b1"],
      params["w2"], params["b2"],
      params["w3"], params["b3"],
      params["w4"], params["b4"])

    mean = mean_padded[:batch] if padded_batch != batch else mean_padded

    # std is state-independent: compute once from the parameter; callers
    # (Normal(mean, std)) broadcast it against mean.
    std = jnp.exp(jnp.clip(params["log_std"], -20.0, 2.0))
    return mean, std


def init_params(key, input_dim, output_dim, hidden_dim=128):
    """Deterministic init matching the module's __init__ shapes:
    orthogonal(gain=sqrt(2)) weights, zero biases, log_std = -1."""
    gain = math.sqrt(2.0)
    ortho = jax.nn.initializers.orthogonal(scale=gain)
    k1, k2, k3, k4 = jax.random.split(key, 4)
    h2 = hidden_dim // 2
    return {
        "w1": ortho(k1, (input_dim, hidden_dim), jnp.float32),
        "b1": jnp.zeros((1, hidden_dim), jnp.float32),
        "w2": ortho(k2, (hidden_dim, hidden_dim), jnp.float32),
        "b2": jnp.zeros((1, hidden_dim), jnp.float32),
        "w3": ortho(k3, (hidden_dim, h2), jnp.float32),
        "b3": jnp.zeros((1, h2), jnp.float32),
        "w4": ortho(k4, (h2, output_dim), jnp.float32),
        "b4": jnp.zeros((1, output_dim), jnp.float32),
        "log_std": jnp.full((1, output_dim), -1.0, jnp.float32),
    }


def _reference_forward(state, p):
    h = jnp.maximum(state @ p["w1"] + p["b1"], 0.0)
    h = jnp.maximum(h @ p["w2"] + p["b2"], 0.0)
    h = jnp.maximum(h @ p["w3"] + p["b3"], 0.0)
    mean = 5.0 * jnp.tanh(h @ p["w4"] + p["b4"])
    std = jnp.exp(jnp.clip(p["log_std"], -20.0, 2.0))
    return mean, std


if __name__ == "__main__":
    # Pendulum-like sizes: state dim 3, action dim 1; small hidden for the test.
    input_dim, output_dim, hidden_dim = 3, 1, 32

    key = jax.random.PRNGKey(0)
    kp, kx1, kx2 = jax.random.split(key, 3)
    params = init_params(kp, input_dim, output_dim, hidden_dim)

    fwd = jax.jit(policy_forward)

    # Case 1: small batch (single tile, no padding).
    state_a = jax.random.normal(kx1, (8, input_dim), jnp.float32)
    mean_a, std_a = fwd(state_a, params)
    jax.block_until_ready((mean_a, std_a))
    ref_mean_a, ref_std_a = _reference_forward(state_a, params)
    assert mean_a.shape == (8, output_dim)
    assert jnp.allclose(mean_a, ref_mean_a, atol=1e-5, rtol=1e-5)
    assert jnp.allclose(std_a, ref_std_a, atol=1e-6, rtol=1e-6)

    # Case 2: batch not a multiple of 8 (exercises padding + a 2-tile grid).
    state_b = jax.random.normal(kx2, (37, input_dim), jnp.float32)
    mean_b, std_b = fwd(state_b, params)
    jax.block_until_ready((mean_b, std_b))
    ref_mean_b, ref_std_b = _reference_forward(state_b, params)
    assert mean_b.shape == (37, output_dim)
    assert jnp.allclose(mean_b, ref_mean_b, atol=1e-5, rtol=1e-5)
    assert jnp.allclose(std_b, ref_std_b, atol=1e-6, rtol=1e-6)

    # TODO(synk): Normal-distribution object (sampling / log_prob) is host-side
    # glue in the PyTorch module; the kernel returns its (mean, std) parameters.
    print("KERNEL_OK")
</pallas_src>

<mosaic_0001>
module attributes {stable_mosaic.version = 11 : i64} {
  func.func @kernel(%arg0: i32, %arg1: memref<8x3xf32, #tpu.memory_space<vmem>>, %arg2: memref<3x32xf32, #tpu.memory_space<vmem>>, %arg3: memref<1x32xf32, #tpu.memory_space<vmem>>, %arg4: memref<32x32xf32, #tpu.memory_space<vmem>>, %arg5: memref<1x32xf32, #tpu.memory_space<vmem>>, %arg6: memref<32x16xf32, #tpu.memory_space<vmem>>, %arg7: memref<1x16xf32, #tpu.memory_space<vmem>>, %arg8: memref<16x1xf32, #tpu.memory_space<vmem>>, %arg9: memref<1x1xf32, #tpu.memory_space<vmem>>, %arg10: memref<8x1xf32, #tpu.memory_space<vmem>>) attributes {dimension_semantics = [#tpu.dimension_semantics<parallel>], iteration_bounds = array<i64: 1>, scalar_prefetch = 0 : i64, scratch_operands = 0 : i64, tpu.core_type = #tpu.core_type<tc>, window_params = [{transform_indices = @transform_0, window_bounds = array<i64: 8, 3>}, {pipeline_mode = #tpu.pipeline_mode<synchronous>, transform_indices = @transform_1, window_bounds = array<i64: 3, 32>}, {pipeline_mode = #tpu.pipeline_mode<synchronous>, transform_indices = @transform_2, window_bounds = array<i64: 1, 32>}, {pipeline_mode = #tpu.pipeline_mode<synchronous>, transform_indices = @transform_3, window_bounds = array<i64: 32, 32>}, {pipeline_mode = #tpu.pipeline_mode<synchronous>, transform_indices = @transform_4, window_bounds = array<i64: 1, 32>}, {pipeline_mode = #tpu.pipeline_mode<synchronous>, transform_indices = @transform_5, window_bounds = array<i64: 32, 16>}, {pipeline_mode = #tpu.pipeline_mode<synchronous>, transform_indices = @transform_6, window_bounds = array<i64: 1, 16>}, {pipeline_mode = #tpu.pipeline_mode<synchronous>, transform_indices = @transform_7, window_bounds = array<i64: 16, 1>}, {pipeline_mode = #tpu.pipeline_mode<synchronous>, transform_indices = @transform_8, window_bounds = array<i64: 1, 1>}, {transform_indices = @transform_9, window_bounds = array<i64: 8, 1>}]} {
    %c0 = arith.constant 0 : index
    %c0_0 = arith.constant 0 : index
    %0 = vector.load %arg1[%c0, %c0_0] : memref<8x3xf32, #tpu.memory_space<vmem>>, vector<8x3xf32>
    %c0_1 = arith.constant 0 : index
    %c0_2 = arith.constant 0 : index
    %1 = vector.load %arg2[%c0_1, %c0_2] : memref<3x32xf32, #tpu.memory_space<vmem>>, vector<3x32xf32>
    %c0_3 = arith.constant 0 : index
    %c0_4 = arith.constant 0 : index
    %2 = vector.load %arg3[%c0_3, %c0_4] : memref<1x32xf32, #tpu.memory_space<vmem>>, vector<1x32xf32>
    %3 = vector.extract_strided_slice %0 {offsets = [0, 0], sizes = [8, 1], strides = [1, 1]} : vector<8x3xf32> to vector<8x1xf32>
    %4 = vector.extract_strided_slice %1 {offsets = [0, 0], sizes = [1, 32], strides = [1, 1]} : vector<3x32xf32> to vector<1x32xf32>
    %5 = vector.broadcast %3 : vector<8x1xf32> to vector<8x32xf32>
    %6 = vector.broadcast %4 : vector<1x32xf32> to vector<8x32xf32>
    %7 = arith.mulf %5, %6 : vector<8x32xf32>
    %8 = vector.broadcast %2 : vector<1x32xf32> to vector<8x32xf32>
    %9 = arith.addf %8, %7 : vector<8x32xf32>
    %10 = vector.extract_strided_slice %0 {offsets = [0, 1], sizes = [8, 1], strides = [1, 1]} : vector<8x3xf32> to vector<8x1xf32>
    %11 = vector.extract_strided_slice %1 {offsets = [1, 0], sizes = [1, 32], strides = [1, 1]} : vector<3x32xf32> to vector<1x32xf32>
    %12 = vector.broadcast %10 : vector<8x1xf32> to vector<8x32xf32>
    %13 = vector.broadcast %11 : vector<1x32xf32> to vector<8x32xf32>
    %14 = arith.mulf %12, %13 : vector<8x32xf32>
    %15 = arith.addf %9, %14 : vector<8x32xf32>
    %16 = vector.extract_strided_slice %0 {offsets = [0, 2], sizes = [8, 1], strides = [1, 1]} : vector<8x3xf32> to vector<8x1xf32>
    %17 = vector.extract_strided_slice %1 {offsets = [2, 0], sizes = [1, 32], strides = [1, 1]} : vector<3x32xf32> to vector<1x32xf32>
    %18 = vector.broadcast %16 : vector<8x1xf32> to vector<8x32xf32>
    %19 = vector.broadcast %17 : vector<1x32xf32> to vector<8x32xf32>
    %20 = arith.mulf %18, %19 : vector<8x32xf32>
    %21 = arith.addf %15, %20 : vector<8x32xf32>
    %cst = arith.constant 0.000000e+00 : f32
    %22 = vector.broadcast %cst : f32 to vector<8x32xf32>
    %23 = arith.maximumf %21, %22 : vector<8x32xf32>
    %c0_5 = arith.constant 0 : index
    %c0_6 = arith.constant 0 : index
    %24 = vector.load %arg4[%c0_5, %c0_6] : memref<32x32xf32, #tpu.memory_space<vmem>>, vector<32x32xf32>
    %cst_7 = arith.constant dense<0.000000e+00> : vector<8x32xf32>
    %25 = tpu.matmul %23, %24, %cst_7 {dimension_numbers = #tpu.dot_dimension_numbers<[1], [0], [0], [1], [0, 0, 1, 1], [], []>} : vector<8x32xf32>, vector<32x32xf32>, vector<8x32xf32> -> vector<8x32xf32>
    %c0_8 = arith.constant 0 : index
    %c0_9 = arith.constant 0 : index
    %26 = vector.load %arg5[%c0_8, %c0_9] : memref<1x32xf32, #tpu.memory_space<vmem>>, vector<1x32xf32>
    %27 = vector.broadcast %26 : vector<1x32xf32> to vector<8x32xf32>
    %28 = arith.addf %25, %27 : vector<8x32xf32>
    %cst_10 = arith.constant 0.000000e+00 : f32
    %29 = vector.broadcast %cst_10 : f32 to vector<8x32xf32>
    %30 = arith.maximumf %28, %29 : vector<8x32xf32>
    %c0_11 = arith.constant 0 : index
    %c0_12 = arith.constant 0 : index
    %31 = vector.load %arg6[%c0_11, %c0_12] : memref<32x16xf32, #tpu.memory_space<vmem>>, vector<32x16xf32>
    %cst_13 = arith.constant dense<0.000000e+00> : vector<8x16xf32>
    %32 = tpu.matmul %30, %31, %cst_13 {dimension_numbers = #tpu.dot_dimension_numbers<[1], [0], [0], [1], [0, 0, 1, 1], [], []>} : vector<8x32xf32>, vector<32x16xf32>, vector<8x16xf32> -> vector<8x16xf32>
    %c0_14 = arith.constant 0 : index
    %c0_15 = arith.constant 0 : index
    %33 = vector.load %arg7[%c0_14, %c0_15] : memref<1x16xf32, #tpu.memory_space<vmem>>, vector<1x16xf32>
    %34 = vector.broadcast %33 : vector<1x16xf32> to vector<8x16xf32>
    %35 = arith.addf %32, %34 : vector<8x16xf32>
    %cst_16 = arith.constant 0.000000e+00 : f32
    %36 = vector.broadcast %cst_16 : f32 to vector<8x16xf32>
    %37 = arith.maximumf %35, %36 : vector<8x16xf32>
    %c0_17 = arith.constant 0 : index
    %c0_18 = arith.constant 0 : index
    %38 = vector.load %arg8[%c0_17, %c0_18] : memref<16x1xf32, #tpu.memory_space<vmem>>, vector<16x1xf32>
    %cst_19 = arith.constant dense<0.000000e+00> : vector<8x1xf32>
    %39 = tpu.matmul %37, %38, %cst_19 {dimension_numbers = #tpu.dot_dimension_numbers<[1], [0], [0], [1], [0, 0, 1, 1], [], []>} : vector<8x16xf32>, vector<16x1xf32>, vector<8x1xf32> -> vector<8x1xf32>
    %c0_20 = arith.constant 0 : index
    %c0_21 = arith.constant 0 : index
    %40 = vector.load %arg9[%c0_20, %c0_21] : memref<1x1xf32, #tpu.memory_space<vmem>>, vector<1x1xf32>
    %41 = vector.broadcast %40 : vector<1x1xf32> to vector<8x1xf32>
    %42 = arith.addf %39, %41 : vector<8x1xf32>
    %43 = math.tanh %42 : vector<8x1xf32>
    %cst_22 = arith.constant 5.000000e+00 : f32
    %44 = vector.broadcast %cst_22 : f32 to vector<8x1xf32>
    %45 = arith.mulf %44, %43 : vector<8x1xf32>
    %c0_23 = arith.constant 0 : index
    %c0_24 = arith.constant 0 : index
    %46 = vector.load %arg10[%c0_23, %c0_24] : memref<8x1xf32, #tpu.memory_space<vmem>>, vector<8x1xf32>
    tpu.vector_store %arg10[%c0_23, %c0_24], %45 {strides = array<i32>} : memref<8x1xf32, #tpu.memory_space<vmem>>, vector<8x1xf32>,
    return
  }
  func.func @transform_0(%arg0: i32) -> (i32, i32) {
    %c0_i32 = arith.constant 0 : i32
    %c0_i32_0 = arith.constant 0 : i32
    return %arg0, %c0_i32 : i32, i32
  }
  func.func @transform_1(%arg0: i32) -> (i32, i32) {
    %c0_i32 = arith.constant 0 : i32
    %c0_i32_0 = arith.constant 0 : i32
    %c0_i32_1 = arith.constant 0 : i32
    return %c0_i32, %c0_i32_0 : i32, i32
  }
  func.func @transform_2(%arg0: i32) -> (i32, i32) {
    %c0_i32 = arith.constant 0 : i32
    %c0_i32_0 = arith.constant 0 : i32
    %c0_i32_1 = arith.constant 0 : i32
    return %c0_i32, %c0_i32_0 : i32, i32
  }
  func.func @transform_3(%arg0: i32) -> (i32, i32) {
    %c0_i32 = arith.constant 0 : i32
    %c0_i32_0 = arith.constant 0 : i32
    %c0_i32_1 = arith.constant 0 : i32
    return %c0_i32, %c0_i32_0 : i32, i32
  }
  func.func @transform_4(%arg0: i32) -> (i32, i32) {
    %c0_i32 = arith.constant 0 : i32
    %c0_i32_0 = arith.constant 0 : i32
    %c0_i32_1 = arith.constant 0 : i32
    return %c0_i32, %c0_i32_0 : i32, i32
  }
  func.func @transform_5(%arg0: i32) -> (i32, i32) {
    %c0_i32 = arith.constant 0 : i32
    %c0_i32_0 = arith.constant 0 : i32
    %c0_i32_1 = arith.constant 0 : i32
    return %c0_i32, %c0_i32_0 : i32, i32
  }
  func.func @transform_6(%arg0: i32) -> (i32, i32) {
    %c0_i32 = arith.constant 0 : i32
    %c0_i32_0 = arith.constant 0 : i32
    %c0_i32_1 = arith.constant 0 : i32
    return %c0_i32, %c0_i32_0 : i32, i32
  }
  func.func @transform_7(%arg0: i32) -> (i32, i32) {
    %c0_i32 = arith.constant 0 : i32
    %c0_i32_0 = arith.constant 0 : i32
    %c0_i32_1 = arith.constant 0 : i32
    return %c0_i32, %c0_i32_0 : i32, i32
  }
  func.func @transform_8(%arg0: i32) -> (i32, i32) {
    %c0_i32 = arith.constant 0 : i32
    %c0_i32_0 = arith.constant 0 : i32
    %c0_i32_1 = arith.constant 0 : i32
    return %c0_i32, %c0_i32_0 : i32, i32
  }
  func.func @transform_9(%arg0: i32) -> (i32, i32) {
    %c0_i32 = arith.constant 0 : i32
    %c0_i32_0 = arith.constant 0 : i32
    return %arg0, %c0_i32 : i32, i32
  }
}

</mosaic_0001>

<bundles_post_ra>
// kernel: policy_forward.1
= control target key start
LH: loop header
LB: loop body
LE: loop exit
PB: predicated region body
PF: predicated region fallthrough
CT: control target
= control target key end

     0   :  { %v413_v0 = vmov 0   ;;  %v414_v2 = vmov 2   ;;  %v415_v5 = vmov 1   ;;  %v416_v7 = vmov 0.0|0.0   ;;  %s523_s0 = inlined_call_operand.vmem [shape: f32[8,3], index: 0, kind: input, shape index: {}]   ;;  %s524_s3 = inlined_call_operand.vmem [shape: f32[32,32], index: 3, kind: input, shape index: {}]   ;;  %s525_s5 = inlined_call_operand.vmem [shape: f32[32,16], index: 5, kind: input, shape index: {}]   ;;  %s526_s1 = inlined_call_operand.vmem [shape: f32[3,32], index: 1, kind: input, shape index: {}]   ;;  %s527_s2 = inlined_call_operand.vmem [shape: f32[1,32], index: 2, kind: input, shape index: {}]   ;;  %s528_s4 = inlined_call_operand.vmem [shape: f32[1,32], index: 4, kind: input, shape index: {}]   ;;  %s529_s7 = inlined_call_operand.vmem [shape: f32[16,1], index: 7, kind: input, shape index: {}]   ;;  %s530_s8 = inlined_call_operand.<no memory space> [shape: f32[1,1], index: 8, kind: input, shape index: {}]   ;;  %s531_s6 = inlined_call_operand.vmem [shape: f32[1,16], index: 6, kind: input, shape index: {}]   ;;  %s532_s9 = inlined_call_operand.vmem [shape: f32[8,1], index: 9, kind: output, shape index: {}]  }
   0x1   :  { %407 = vset.pattern.permute.xlu0 %v413_v0  ;;  %v34_v1 = vld [vmem:[%s523_s0] sm:$0xff]  ;;  %409 = vset.pattern.permute.xlu1 %v414_v2  ;;  %v76_v4 = vld [vmem:[%s524_s3 + $0x8] sm:$0xff]  ;;  %v77_v8 = vld [vmem:[%s524_s3 + $0x10] sm:$0xff]  ;;  %vm417_vm0 = vmmov 0   ;;  %v418_v11 = vmov 0.0   ;;  %v42_v15 = vlaneseq  ;;  %vm86_vm1 = vcmask 261120  }
   0x2   :  { %39 = vperm.xlu0 %407, %v34_v1   ;;  %65 = vperm.xlu1 %409, %v34_v1   ;;  %v75_v3 = vld [vmem:[%s524_s3] sm:$0xff]  ;;  %v78_v9 = vld [vmem:[%s524_s3 + $0x18] sm:$0xff]  ;;  %v162_v13 = vld [vmem:[%s525_s5 + $0x8] sm:$0xff]  ;;  %v14_v46 = vstv %s530_s8  ;;  %vm255_vm2 = vcmask 130048   ;;  %vm331_vm3 = vcmask 7168  }
   0x3   :  { %v387_v6 = vpack.c.bf16 %v76_v4, %v75_v3  ;;  %386 = vmatprep.subr.bf16.mxu0 %v416_v7  ;;  %392 = vmatprep.subr.bf16.mxu1 %v416_v7  ;;  %v390_v10 = vpack.c.bf16 %v78_v9, %v77_v8  ;;  %v161_v12 = vld [vmem:[%s525_s5] sm:$0xff]  ;;  %v43_v16 = vshrl.u32 %v42_v15, 7  ;;  %v163_v35 = vld [vmem:[%s525_s5 + $0x10] sm:$0xff]  ;;  %v164_v36 = vld [vmem:[%s525_s5 + $0x18] sm:$0xff]  ;;  %15 = vst [vmem:[#allocation2] sm:$0x1] %v14_v46 }
   0x4   :  { %365 = vmatprep.mubr.msk.f32.mxu0 %vm417_vm0, %v418_v11  ;;  %376 = vmatprep.mubr.msk.f32.mxu1 %vm417_vm0, %v418_v11  ;;  %v393_v14 = vpack.c.bf16 %v162_v13, %v161_v12  ;;  %v35_v18 = vld [vmem:[%s526_s1] sm:$0x7]  ;;  %v396_v37 = vpack.c.bf16 %v164_v36, %v163_v35  ;;  %v247_v44 = vld [vmem:[%s529_s7 + $0x8] sm:$0xff] }
   0x5   :  { %388 = vmatpush3.bf16.msra.mxu0 %v387_v6  ;;  %v44_v17 = vsub.s32 0, %v43_v16  ;;  %v60_v20 = vsub.s32 1, %v43_v16  ;;  %v70_v21 = vsub.s32 2, %v43_v16  ;;  %v337_v26 = vld [vmem:[%s527_s2] ss:$0 sm:$0xff] }
   0x6   :  { %408 = vset.pattern.permute.xlu0 %v415_v5  ;;  %389 = vmatprep.subr.bf16.mxu0 %v416_v7  ;;  %v338_v38 = vld [vmem:[%s528_s4] ss:$0 sm:$0xff] }
   0x7   :  { %55 = vperm.xlu0 %408, %v34_v1   ;;  %394 = vmatpush3.bf16.msra.mxu1 %v393_v14  ;;  %v45_v19 = vrot.slane %v35_v18, %v44_v17  ;;  %v61_v24 = vrot.slane %v35_v18, %v60_v20  ;;  %v71_v25 = vrot.slane %v35_v18, %v70_v21  ;;  %v246_v43 = vld [vmem:[%s529_s7] sm:$0xff] }
   0x8   :  { %395 = vmatprep.subr.bf16.mxu1 %v416_v7  ;;  %v399_v45 = vpack.c.bf16 %v247_v44, %v246_v43  ;;  %v340_v47 = vld [vmem:[%s531_s6] ss:$0 sm:$0xff] }
   0x9   :  { %391 = vmatpush3.bf16.msra.mxu0 %v390_v10 }
   0xa   :  { %398 = vmatprep.subr.bf16.mxu0 %v416_v7  ;;  %v342_v52 = vld [vmem:[#allocation2] ss:$0 sm:$0xff] }
   0xb   :  { %410 = vset.pattern.permute.xlu0 %v414_v2  ;;  %397 = vmatpush3.bf16.msra.mxu1 %v396_v37 }
  0x81   :  { %v40_v22 = vpop.permute.xlu0 %39  ;;  %v66_v27 = vpop.permute.xlu1 %65 }
  0x82   :  { %v46_v23 = vmul.f32 %v45_v19, %v40_v22  ;;  %v72_v31 = vmul.f32 %v71_v25, %v66_v27 }
  0x84   :  { %v53_v29 = vadd.f32 %v337_v26, %v46_v23 }
  0x86   :  { %v56_v28 = vpop.permute.xlu0 %55 }
  0x87   :  { %v62_v30 = vmul.f32 %v61_v24, %v56_v28 }
  0x89   :  { %v63_v32 = vadd.f32 %v62_v30, %v53_v29 }
  0x8b   :  { %v73_v33 = vadd.f32 %v72_v31, %v63_v32 }
  0x8d   :  { %v74_v34 = vmax.f32 %v73_v33, 0.0 }
  0x8f   :  { %366 = vmatmul.mubr.msk.f32.vlgmr.msra.gmra.mrb[0].mxu0 %vm86_vm1, %v74_v34 }
  0x90   :  { %383 = vmatprep.mubr.msk.f32.mxu0 %vm417_vm0, %v418_v11  ;;  %400 = vmatpush3.bf16.msra.mxu0 %v399_v45 }
 0x162   :  { %v156_v39 = vpop.f32.mrb[0].mxu0 }
 0x163   :  { %v157_v40 = vadd.f32 %v338_v38, %v156_v39  ;;  %v367_v41 = vpop.f32.mrb[1].mxu0 }
 0x165   :  { %v160_v42 = vmax.f32 %v157_v40, 0.0 }
 0x167   :  { %377 = vmatmul.mubr.msk.f32.vlgmr.msra.gmra.mrb[0].mxu1 %vm86_vm1, %v160_v42 }
 0x23a   :  { %v241_v48 = vpop.f32.mrb[0].mxu1 }
 0x23b   :  { %v242_v49 = vadd.f32 %v340_v47, %v241_v48  ;;  %v378_v50 = vpop.f32.mrb[1].mxu1 }
 0x23d   :  { %v245_v51 = vmax.f32 %v242_v49, 0.0 }
 0x23f   :  { %384 = vmatmul.mubr.msk.f32.vlgmr.msra.gmra.mrb[2].mxu0 %vm255_vm2, %v245_v51 }
 0x312   :  { %v325_v53 = vpop.f32.mrb[2].mxu0 }
 0x313   :  { %v326_v54 = vadd.f32 %v342_v52, %v325_v53  ;;  %v385_v55 = vpop.f32.mrb[3].mxu0 }
 0x315   :  { %411 = vtanh.f32 %v326_v54 }
 0x31f   :  { %v412_v56 = vpop.eup %411 }
 0x320   :  { %v330_v57 = vmul.f32 5.0, %v412_v56 }
 0x322   :  { %332 = vst.msk [vmem:[%s532_s9] sm:$0xff] %vm331_vm3, %v330_v57 }

</bundles_post_ra>
